<compile_context>
chip_gen: v7x
topology: tpu7x:2x2x1
jax: 0.10.0
libtpu: 0.0.40
codegen_flags: <defaults>
</compile_context>

<pallas_src>
import jax
import jax.numpy as jnp
from jax.experimental import pallas as pl
from jax.experimental.pallas import tpu as pltpu

IN_FEATURES = 10
HIDDEN = 500

IN_PAD = 16        # fc1 input dim padded to a sublane-friendly size
HIDDEN_PAD = 512   # hidden (contraction) dim padded to a multiple of 128
TB_MAX = 1024      # max batch tile (multiple of 8); ~12 MiB VMEM footprint


def _round_up(x, m):
    return (x + m - 1) // m * m


def _ceil_div(a, b):
    return (a + b - 1) // b


def _choose_batch_tiling(B):
    """Pick (TB, B_pad) such that:
         * TB is a multiple of 8 (sublane constraint) and TB <= TB_MAX,
         * B_pad % TB == 0,
         * for B >= 16 the grid has >= 2 steps (even count at large B) so the
           'parallel' batch axis shards across v7x's two TensorCores."""
    if B < 16:
        tb = max(8, _round_up(B, 8))
        return tb, tb
    if B <= 2 * TB_MAX:
        tb = _round_up(_ceil_div(B, 2), 8)     # exactly 2 grid steps
        return tb, 2 * tb
    n = _ceil_div(B, TB_MAX)
    if n % 2:                                  # even step count for 2-TC balance
        n += 1
    return TB_MAX, n * TB_MAX


def encoder_kernel(x_ref, w1_ref, b1_ref, w2_ref, b2_ref, w3_ref, b3_ref, o_ref):
    # fc1 + ReLU  (dropout is identity in eval mode)
    x = x_ref[...].astype(jnp.bfloat16)
    h = jnp.dot(x, w1_ref[...], preferred_element_type=jnp.float32)
    h = jnp.maximum(h + b1_ref[...], 0.0)

    # fc2 + ReLU
    h = jnp.dot(h.astype(jnp.bfloat16), w2_ref[...],
                preferred_element_type=jnp.float32)
    h = jnp.maximum(h + b2_ref[...], 0.0)

    # fc3 + ReLU -- true 500-wide output, stored directly (no wrapper slice)
    h = jnp.dot(h.astype(jnp.bfloat16), w3_ref[...],
                preferred_element_type=jnp.float32)
    o_ref[...] = jnp.maximum(h + b3_ref[...], 0.0).astype(o_ref.dtype)


def encoder_forward(x, params, out_dtype=jnp.float32):
    """x: (B, IN_FEATURES) float32 -> (B, 1, HIDDEN) out_dtype."""
    w1, b1, w2, b2, w3, b3 = params
    B = x.shape[0]

    TB, B_pad = _choose_batch_tiling(B)

    # Zero-pad batch / input-feature dims host-side; padded rows/cols are
    # harmless because the corresponding weight rows are zero and padded
    # output rows are sliced off below.
    x_pad = jnp.zeros((B_pad, IN_PAD), jnp.float32).at[:B, :IN_FEATURES].set(x)

    grid = (B_pad // TB,)

    # Advisory cost hint for XLA's scheduler around the custom call.
    out_itemsize = jnp.dtype(out_dtype).itemsize
    flops = int(B_pad) * 2 * (IN_PAD * HIDDEN_PAD
                              + HIDDEN_PAD * HIDDEN_PAD
                              + HIDDEN_PAD * HIDDEN)
    bytes_accessed = (
        sum(int(a.size) * a.dtype.itemsize for a in (w1, b1, w2, b2, w3, b3))
        + int(B_pad) * IN_PAD * 4
        + int(B_pad) * HIDDEN * out_itemsize)

    out = pl.pallas_call(
        encoder_kernel,
        out_shape=jax.ShapeDtypeStruct((B_pad, HIDDEN), out_dtype),
        grid=grid,
        in_specs=[
            pl.BlockSpec((TB, IN_PAD), lambda i: (i, 0)),
            # Weights/biases: constant index map -> fetched once, stay resident.
            pl.BlockSpec((IN_PAD, HIDDEN_PAD), lambda i: (0, 0)),
            pl.BlockSpec((1, HIDDEN_PAD), lambda i: (0, 0)),
            pl.BlockSpec((HIDDEN_PAD, HIDDEN_PAD), lambda i: (0, 0)),
            pl.BlockSpec((1, HIDDEN_PAD), lambda i: (0, 0)),
            pl.BlockSpec((HIDDEN_PAD, HIDDEN), lambda i: (0, 0)),
            pl.BlockSpec((1, HIDDEN), lambda i: (0, 0)),
        ],
        out_specs=pl.BlockSpec((TB, HIDDEN), lambda i: (i, 0)),
        compiler_params=pltpu.CompilerParams(
            dimension_semantics=("parallel",),
            # Lift v5e's 16 MiB scoped default so the TB=1024 tile (~12 MiB
            # incl. double buffers) compiles there; no-op on v6e/v7x (32 MiB).
            vmem_limit_bytes=32 * 1024 * 1024,
        ),
        cost_estimate=pl.CostEstimate(
            flops=flops, transcendentals=0, bytes_accessed=bytes_accessed),
    )(x_pad, w1, b1, w2, b2, w3, b3)

    # Drop batch padding (contiguous prefix slice; no-op when B == B_pad) and
    # restore the singleton axis from PyTorch's unsqueeze(1) (layout-preserving
    # reshape -> bitcast, no copy).
    if B != B_pad:
        out = out[:B]
    return out.reshape(B, 1, HIDDEN)


def init_params(key):
    """Deterministic init mimicking PyTorch Linear default
    (U[-1/sqrt(fan_in), +1/sqrt(fan_in)]).

    Weights are stored transposed relative to PyTorch and zero-padded on the
    contraction dims:
      w1: (IN_PAD, HIDDEN_PAD) bf16, w2: (HIDDEN_PAD, HIDDEN_PAD) bf16,
      w3: (HIDDEN_PAD, HIDDEN)  bf16  (true 500-wide output column count).
    Biases are f32, zero-padded to match each layer's output width.
    """
    keys = jax.random.split(key, 6)

    def linear(kw, kb, fan_in, fan_out, in_pad, out_pad):
        bound = 1.0 / jnp.sqrt(jnp.float32(fan_in))
        w = jax.random.uniform(kw, (fan_in, fan_out), jnp.float32, -bound, bound)
        b = jax.random.uniform(kb, (1, fan_out), jnp.float32, -bound, bound)
        w_pad = jnp.zeros((in_pad, out_pad), jnp.float32).at[:fan_in, :fan_out].set(w)
        b_pad = jnp.zeros((1, out_pad), jnp.float32).at[:, :fan_out].set(b)
        return w_pad.astype(jnp.bfloat16), b_pad

    w1, b1 = linear(keys[0], keys[1], IN_FEATURES, HIDDEN, IN_PAD, HIDDEN_PAD)
    w2, b2 = linear(keys[2], keys[3], HIDDEN, HIDDEN, HIDDEN_PAD, HIDDEN_PAD)
    w3, b3 = linear(keys[4], keys[5], HIDDEN, HIDDEN, HIDDEN_PAD, HIDDEN)
    return (w1, b1, w2, b2, w3, b3)


def reference_forward(x, params):
    """Pure-JAX reference mimicking the kernel's bf16-weight / f32-accumulate
    math path (for a sanity check)."""
    w1, b1, w2, b2, w3, b3 = params

    def layer(h, w, b):
        h16 = h.astype(jnp.bfloat16).astype(jnp.float32)
        w32 = w.astype(jnp.float32)
        y = jnp.dot(h16, w32, precision=jax.lax.Precision.HIGHEST) + b
        return jnp.maximum(y, 0.0)

    B = x.shape[0]
    xp = jnp.zeros((B, IN_PAD), jnp.float32).at[:, :IN_FEATURES].set(x)
    h = layer(xp, w1, b1)
    h = layer(h, w2, b2)
    h = layer(h, w3, b3)          # already (B, HIDDEN): w3 output is unpadded
    return h.reshape(B, 1, HIDDEN)


if __name__ == "__main__":
    key = jax.random.PRNGKey(0)
    k_params, k_x = jax.random.split(key)

    params = init_params(k_params)
    batch = 2
    x = jax.random.normal(k_x, (batch, IN_FEATURES), jnp.float32)

    out = encoder_forward(x, params)
    out = jax.block_until_ready(out)

    ref = reference_forward(x, params)
    assert out.shape == (batch, 1, HIDDEN), out.shape
    # bf16 weight path -> loosened tolerance vs the f32-ish reference.
    assert jnp.allclose(out, ref, atol=1e-2, rtol=1e-2), "mismatch vs JAX reference"

    print("KERNEL_OK")
</pallas_src>

<mosaic_0001>
module attributes {stable_mosaic.version = 11 : i64} {
  func.func @encoder_kernel(%arg0: i32, %arg1: memref<8x16xf32, #tpu.memory_space<vmem>>, %arg2: memref<16x512xbf16, #tpu.memory_space<vmem>>, %arg3: memref<1x512xf32, #tpu.memory_space<vmem>>, %arg4: memref<512x512xbf16, #tpu.memory_space<vmem>>, %arg5: memref<1x512xf32, #tpu.memory_space<vmem>>, %arg6: memref<512x500xbf16, #tpu.memory_space<vmem>>, %arg7: memref<1x500xf32, #tpu.memory_space<vmem>>, %arg8: memref<8x500xf32, #tpu.memory_space<vmem>>) attributes {dimension_semantics = [#tpu.dimension_semantics<parallel>], iteration_bounds = array<i64: 1>, scalar_prefetch = 0 : i64, scratch_operands = 0 : i64, tpu.core_type = #tpu.core_type<tc>, window_params = [{transform_indices = @transform_0, window_bounds = array<i64: 8, 16>}, {pipeline_mode = #tpu.pipeline_mode<synchronous>, transform_indices = @transform_1, window_bounds = array<i64: 16, 512>}, {pipeline_mode = #tpu.pipeline_mode<synchronous>, transform_indices = @transform_2, window_bounds = array<i64: 1, 512>}, {pipeline_mode = #tpu.pipeline_mode<synchronous>, transform_indices = @transform_3, window_bounds = array<i64: 512, 512>}, {pipeline_mode = #tpu.pipeline_mode<synchronous>, transform_indices = @transform_4, window_bounds = array<i64: 1, 512>}, {pipeline_mode = #tpu.pipeline_mode<synchronous>, transform_indices = @transform_5, window_bounds = array<i64: 512, 500>}, {pipeline_mode = #tpu.pipeline_mode<synchronous>, transform_indices = @transform_6, window_bounds = array<i64: 1, 500>}, {transform_indices = @transform_7, window_bounds = array<i64: 8, 500>}]} {
    %c0 = arith.constant 0 : index
    %c0_0 = arith.constant 0 : index
    %0 = vector.load %arg1[%c0, %c0_0] : memref<8x16xf32, #tpu.memory_space<vmem>>, vector<8x16xf32>
    %1 = arith.truncf %0 : vector<8x16xf32> to vector<8x16xbf16>
    %c0_1 = arith.constant 0 : index
    %c0_2 = arith.constant 0 : index
    %2 = vector.load %arg2[%c0_1, %c0_2] : memref<16x512xbf16, #tpu.memory_space<vmem>>, vector<16x512xbf16>
    %cst = arith.constant dense<0.000000e+00> : vector<8x512xf32>
    %3 = tpu.matmul %1, %2, %cst {dimension_numbers = #tpu.dot_dimension_numbers<[1], [0], [0], [1], [0, 0, 1, 1], [], []>} : vector<8x16xbf16>, vector<16x512xbf16>, vector<8x512xf32> -> vector<8x512xf32>
    %c0_3 = arith.constant 0 : index
    %c0_4 = arith.constant 0 : index
    %4 = vector.load %arg3[%c0_3, %c0_4] : memref<1x512xf32, #tpu.memory_space<vmem>>, vector<1x512xf32>
    %5 = vector.broadcast %4 : vector<1x512xf32> to vector<8x512xf32>
    %6 = arith.addf %3, %5 : vector<8x512xf32>
    %cst_5 = arith.constant 0.000000e+00 : f32
    %7 = vector.broadcast %cst_5 : f32 to vector<8x512xf32>
    %8 = arith.maximumf %6, %7 : vector<8x512xf32>
    %9 = arith.truncf %8 : vector<8x512xf32> to vector<8x512xbf16>
    %c0_6 = arith.constant 0 : index
    %c0_7 = arith.constant 0 : index
    %10 = vector.load %arg4[%c0_6, %c0_7] : memref<512x512xbf16, #tpu.memory_space<vmem>>, vector<512x512xbf16>
    %cst_8 = arith.constant dense<0.000000e+00> : vector<8x512xf32>
    %11 = tpu.matmul %9, %10, %cst_8 {dimension_numbers = #tpu.dot_dimension_numbers<[1], [0], [0], [1], [0, 0, 1, 1], [], []>} : vector<8x512xbf16>, vector<512x512xbf16>, vector<8x512xf32> -> vector<8x512xf32>
    %c0_9 = arith.constant 0 : index
    %c0_10 = arith.constant 0 : index
    %12 = vector.load %arg5[%c0_9, %c0_10] : memref<1x512xf32, #tpu.memory_space<vmem>>, vector<1x512xf32>
    %13 = vector.broadcast %12 : vector<1x512xf32> to vector<8x512xf32>
    %14 = arith.addf %11, %13 : vector<8x512xf32>
    %cst_11 = arith.constant 0.000000e+00 : f32
    %15 = vector.broadcast %cst_11 : f32 to vector<8x512xf32>
    %16 = arith.maximumf %14, %15 : vector<8x512xf32>
    %17 = arith.truncf %16 : vector<8x512xf32> to vector<8x512xbf16>
    %c0_12 = arith.constant 0 : index
    %c0_13 = arith.constant 0 : index
    %18 = vector.load %arg6[%c0_12, %c0_13] : memref<512x500xbf16, #tpu.memory_space<vmem>>, vector<512x500xbf16>
    %cst_14 = arith.constant dense<0.000000e+00> : vector<8x500xf32>
    %19 = tpu.matmul %17, %18, %cst_14 {dimension_numbers = #tpu.dot_dimension_numbers<[1], [0], [0], [1], [0, 0, 1, 1], [], []>} : vector<8x512xbf16>, vector<512x500xbf16>, vector<8x500xf32> -> vector<8x500xf32>
    %c0_15 = arith.constant 0 : index
    %c0_16 = arith.constant 0 : index
    %20 = vector.load %arg7[%c0_15, %c0_16] : memref<1x500xf32, #tpu.memory_space<vmem>>, vector<1x500xf32>
    %21 = vector.broadcast %20 : vector<1x500xf32> to vector<8x500xf32>
    %22 = arith.addf %19, %21 : vector<8x500xf32>
    %cst_17 = arith.constant 0.000000e+00 : f32
    %23 = vector.broadcast %cst_17 : f32 to vector<8x500xf32>
    %24 = arith.maximumf %22, %23 : vector<8x500xf32>
    %c0_18 = arith.constant 0 : index
    %c0_19 = arith.constant 0 : index
    %25 = vector.load %arg8[%c0_18, %c0_19] : memref<8x500xf32, #tpu.memory_space<vmem>>, vector<8x500xf32>
    tpu.vector_store %arg8[%c0_18, %c0_19], %24 {strides = array<i32>} : memref<8x500xf32, #tpu.memory_space<vmem>>, vector<8x500xf32>,
    return
  }
  func.func @transform_0(%arg0: i32) -> (i32, i32) {
    %c0_i32 = arith.constant 0 : i32
    %c0_i32_0 = arith.constant 0 : i32
    return %arg0, %c0_i32 : i32, i32
  }
  func.func @transform_1(%arg0: i32) -> (i32, i32) {
    %c0_i32 = arith.constant 0 : i32
    %c0_i32_0 = arith.constant 0 : i32
    %c0_i32_1 = arith.constant 0 : i32
    return %c0_i32, %c0_i32_0 : i32, i32
  }
  func.func @transform_2(%arg0: i32) -> (i32, i32) {
    %c0_i32 = arith.constant 0 : i32
    %c0_i32_0 = arith.constant 0 : i32
    %c0_i32_1 = arith.constant 0 : i32
    return %c0_i32, %c0_i32_0 : i32, i32
  }
  func.func @transform_3(%arg0: i32) -> (i32, i32) {
    %c0_i32 = arith.constant 0 : i32
    %c0_i32_0 = arith.constant 0 : i32
    %c0_i32_1 = arith.constant 0 : i32
    return %c0_i32, %c0_i32_0 : i32, i32
  }
  func.func @transform_4(%arg0: i32) -> (i32, i32) {
    %c0_i32 = arith.constant 0 : i32
    %c0_i32_0 = arith.constant 0 : i32
    %c0_i32_1 = arith.constant 0 : i32
    return %c0_i32, %c0_i32_0 : i32, i32
  }
  func.func @transform_5(%arg0: i32) -> (i32, i32) {
    %c0_i32 = arith.constant 0 : i32
    %c0_i32_0 = arith.constant 0 : i32
    %c0_i32_1 = arith.constant 0 : i32
    return %c0_i32, %c0_i32_0 : i32, i32
  }
  func.func @transform_6(%arg0: i32) -> (i32, i32) {
    %c0_i32 = arith.constant 0 : i32
    %c0_i32_0 = arith.constant 0 : i32
    %c0_i32_1 = arith.constant 0 : i32
    return %c0_i32, %c0_i32_0 : i32, i32
  }
  func.func @transform_7(%arg0: i32) -> (i32, i32) {
    %c0_i32 = arith.constant 0 : i32
    %c0_i32_0 = arith.constant 0 : i32
    return %arg0, %c0_i32 : i32, i32
  }
}

</mosaic_0001>

<bundles_post_ra>
// kernel: tpu_custom_call.1
= control target key start
LH: loop header
LB: loop body
LE: loop exit
PB: predicated region body
PF: predicated region fallthrough
CT: control target
= control target key end

     0   :  { %v2811_v2 = vmov 0   ;;  %vm76_vm0 = vcmask 130048   ;;  %s3701_s0 = inlined_call_operand.vmem [shape: f32[8,16], index: 0, kind: input, shape index: {}]   ;;  %s3702_s1 = inlined_call_operand.vmem [shape: bf16[16,512], index: 1, kind: input, shape index: {}]   ;;  %s3703_s2 = inlined_call_operand.vmem [shape: f32[1,512], index: 2, kind: input, shape index: {}]   ;;  %s3704_s3 = inlined_call_operand.vmem [shape: bf16[512,512], index: 3, kind: input, shape index: {}]   ;;  %s3705_s4 = inlined_call_operand.vmem [shape: f32[1,512], index: 4, kind: input, shape index: {}]   ;;  %s3706_s5 = inlined_call_operand.vmem [shape: bf16[512,500], index: 5, kind: input, shape index: {}]   ;;  %s3707_s6 = inlined_call_operand.vmem [shape: f32[1,500], index: 6, kind: input, shape index: {}]   ;;  %s3708_s7 = inlined_call_operand.hbm [shape: f32[8,500], index: 7, kind: output, shape index: {}]  }
   0x1   :  { %v2397_v0 = vld [vmem:[%s3702_s1 + $0x4] ss:$16 sps:$4 sm:$0xff]   ;;  %v2399_v1 = vld [vmem:[%s3702_s1] ss:$16 sps:$4 sm:$0xff]   ;;  %112 = vmatprep.mubr.bf16.mxu0 %v2811_v2  ;;  %153 = vmatprep.mubr.bf16.mxu1 %v2811_v2  ;;  %v2400_v5 = vld [vmem:[%s3702_s1 + $0xc] ss:$16 sps:$4 sm:$0xff]  }
   0x2   :  { %v28_v3 = vld [vmem:[%s3701_s0] sm:$0xff]  ;;  %80 = vmatprep.subr.bf16.mxu0 %v2397_v0  ;;  %v2402_v6 = vld [vmem:[%s3702_s1 + $0x8] ss:$16 sps:$4 sm:$0xff]   ;;  %121 = vmatprep.subr.bf16.mxu1 %v2400_v5  ;;  %v2408_v10 = vld [vmem:[%s3704_s3 + $0xc] ss:$16 sps:$4 sm:$0xff]  }
   0x3   :  { %v29_v4 = vpack.c.bf16 %v28_v3, %v28_v3  ;;  %81 = vmatpush1.bf16.msra.mxu0 %v2399_v1  ;;  %v2403_v7 = vld [vmem:[%s3704_s3] ss:$16 sps:$4 sm:$0xff]   ;;  %v2405_v8 = vld [vmem:[%s3704_s3 + $0x4] ss:$16 sps:$4 sm:$0xff]   ;;  %122 = vmatpush1.bf16.msra.mxu1 %v2402_v6  ;;  %v2406_v9 = vld [vmem:[%s3704_s3 + $0x8] ss:$16 sps:$4 sm:$0xff]  }
   0x4   :  { %960 = vmatprep.subr.bf16.mxu0 %v2405_v8  ;;  %v2411_v11 = vld [vmem:[%s3704_s3 + $0x24] ss:$16 sps:$4 sm:$0xff]   ;;  %1042 = vmatprep.subr.bf16.mxu1 %v2408_v10  ;;  %v2409_v12 = vld [vmem:[%s3704_s3 + $0x20] ss:$16 sps:$4 sm:$0xff]   ;;  %v2414_v13 = vld [vmem:[%s3704_s3 + $0x2c] ss:$16 sps:$4 sm:$0xff]  }
   0x5   :  { %v2412_v14 = vld [vmem:[%s3704_s3 + $0x28] ss:$16 sps:$4 sm:$0xff]   ;;  %v2417_v15 = vld [vmem:[%s3704_s3 + $0x44] ss:$16 sps:$4 sm:$0xff]   ;;  %v2420_v16 = vld [vmem:[%s3704_s3 + $0x4c] ss:$16 sps:$4 sm:$0xff]  }
   0x6   :  { %2113 = vmatmul.mubr.msk.bf16.vlgmr.msra.gmra.mrb[0].mxu0 %vm76_vm0, %v29_v4  ;;  %2114 = vmatmul.mubr.msk.bf16.vlgmr.msra.gmra.mrb[0].mxu1 %vm76_vm0, %v29_v4  ;;  %v2415_v17 = vld [vmem:[%s3704_s3 + $0x40] ss:$16 sps:$4 sm:$0xff]   ;;  %v2423_v18 = vld [vmem:[%s3704_s3 + $0x64] ss:$16 sps:$4 sm:$0xff]   ;;  %v2418_v19 = vld [vmem:[%s3704_s3 + $0x48] ss:$16 sps:$4 sm:$0xff]  }
   0x7   :  { %961 = vmatpush1.bf16.msra.mxu0 %v2403_v7  ;;  %1043 = vmatpush1.bf16.msra.mxu1 %v2406_v9  ;;  %v2426_v20 = vld [vmem:[%s3704_s3 + $0x6c] ss:$16 sps:$4 sm:$0xff]   ;;  %v2421_v21 = vld [vmem:[%s3704_s3 + $0x60] ss:$16 sps:$4 sm:$0xff]   ;;  %v2429_v22 = vld [vmem:[%s3704_s3 + $0x84] ss:$16 sps:$4 sm:$0xff]  }
   0x8   :  { %962 = vmatprep.subr.bf16.mxu0 %v2411_v11  ;;  %1044 = vmatprep.subr.bf16.mxu1 %v2414_v13  ;;  %v2424_v23 = vld [vmem:[%s3704_s3 + $0x68] ss:$16 sps:$4 sm:$0xff]   ;;  %v2432_v24 = vld [vmem:[%s3704_s3 + $0x8c] ss:$16 sps:$4 sm:$0xff]   ;;  %v2427_v25 = vld [vmem:[%s3704_s3 + $0x80] ss:$16 sps:$4 sm:$0xff]  }
   0x9   :  { %v2435_v26 = vld [vmem:[%s3704_s3 + $0xa4] ss:$16 sps:$4 sm:$0xff]   ;;  %v2430_v27 = vld [vmem:[%s3704_s3 + $0x88] ss:$16 sps:$4 sm:$0xff]   ;;  %v2438_v28 = vld [vmem:[%s3704_s3 + $0xac] ss:$16 sps:$4 sm:$0xff]  }
   0xa   :  { %v2433_v29 = vld [vmem:[%s3704_s3 + $0xa0] ss:$16 sps:$4 sm:$0xff]   ;;  %v2441_v30 = vld [vmem:[%s3704_s3 + $0xc4] ss:$16 sps:$4 sm:$0xff]   ;;  %v2436_v31 = vld [vmem:[%s3704_s3 + $0xa8] ss:$16 sps:$4 sm:$0xff]  }
   0xb   :  { %963 = vmatpush1.bf16.msra.mxu0 %v2409_v12  ;;  %1045 = vmatpush1.bf16.msra.mxu1 %v2412_v14  ;;  %v2444_v32 = vld [vmem:[%s3704_s3 + $0xcc] ss:$16 sps:$4 sm:$0xff]   ;;  %v2439_v33 = vld [vmem:[%s3704_s3 + $0xc0] ss:$16 sps:$4 sm:$0xff]   ;;  %v2447_v34 = vld [vmem:[%s3704_s3 + $0xe4] ss:$16 sps:$4 sm:$0xff]  }
   0xc   :  { %964 = vmatprep.subr.bf16.mxu0 %v2417_v15  ;;  %1046 = vmatprep.subr.bf16.mxu1 %v2420_v16  ;;  %v2442_v35 = vld [vmem:[%s3704_s3 + $0xc8] ss:$16 sps:$4 sm:$0xff]   ;;  %v2450_v36 = vld [vmem:[%s3704_s3 + $0xec] ss:$16 sps:$4 sm:$0xff]   ;;  %v2445_v37 = vld [vmem:[%s3704_s3 + $0xe0] ss:$16 sps:$4 sm:$0xff]  }
   0xd   :  { %v2453_v38 = vld [vmem:[%s3704_s3 + $0x104] ss:$16 sps:$4 sm:$0xff]   ;;  %v2448_v39 = vld [vmem:[%s3704_s3 + $0xe8] ss:$16 sps:$4 sm:$0xff]   ;;  %v2456_v40 = vld [vmem:[%s3704_s3 + $0x10c] ss:$16 sps:$4 sm:$0xff]  }
   0xe   :  { %v2451_v41 = vld [vmem:[%s3704_s3 + $0x100] ss:$16 sps:$4 sm:$0xff]   ;;  %v2459_v42 = vld [vmem:[%s3704_s3 + $0x124] ss:$16 sps:$4 sm:$0xff]   ;;  %v2454_v43 = vld [vmem:[%s3704_s3 + $0x108] ss:$16 sps:$4 sm:$0xff]  }
   0xf   :  { %965 = vmatpush1.bf16.msra.mxu0 %v2415_v17  ;;  %1047 = vmatpush1.bf16.msra.mxu1 %v2418_v19  ;;  %v2457_v44 = vld [vmem:[%s3704_s3 + $0x120] ss:$16 sps:$4 sm:$0xff]   ;;  %v2462_v45 = vld [vmem:[%s3704_s3 + $0x12c] ss:$16 sps:$4 sm:$0xff]   ;;  %v2460_v46 = vld [vmem:[%s3704_s3 + $0x128] ss:$16 sps:$4 sm:$0xff]  }
  0x10   :  { %966 = vmatprep.subr.bf16.mxu0 %v2423_v18  ;;  %1048 = vmatprep.subr.bf16.mxu1 %v2426_v20  ;;  %v2465_v47 = vld [vmem:[%s3704_s3 + $0x144] ss:$16 sps:$4 sm:$0xff]   ;;  %v2468_v48 = vld [vmem:[%s3704_s3 + $0x14c] ss:$16 sps:$4 sm:$0xff]   ;;  %v2463_v49 = vld [vmem:[%s3704_s3 + $0x140] ss:$16 sps:$4 sm:$0xff]  }
  0x11   :  { %v2471_v50 = vld [vmem:[%s3704_s3 + $0x164] ss:$16 sps:$4 sm:$0xff]   ;;  %v2466_v51 = vld [vmem:[%s3704_s3 + $0x148] ss:$16 sps:$4 sm:$0xff]   ;;  %v2474_v52 = vld [vmem:[%s3704_s3 + $0x16c] ss:$16 sps:$4 sm:$0xff]  }
  0x12   :  { %v2469_v53 = vld [vmem:[%s3704_s3 + $0x160] ss:$16 sps:$4 sm:$0xff]   ;;  %v2477_v54 = vld [vmem:[%s3704_s3 + $0x184] ss:$16 sps:$4 sm:$0xff]   ;;  %v2472_v55 = vld [vmem:[%s3704_s3 + $0x168] ss:$16 sps:$4 sm:$0xff]  }
  0x13   :  { %967 = vmatpush1.bf16.msra.mxu0 %v2421_v21  ;;  %1049 = vmatpush1.bf16.msra.mxu1 %v2424_v23  ;;  %v2480_v56 = vld [vmem:[%s3704_s3 + $0x18c] ss:$16 sps:$4 sm:$0xff]   ;;  %v2475_v57 = vld [vmem:[%s3704_s3 + $0x180] ss:$16 sps:$4 sm:$0xff]   ;;  %v2483_v58 = vld [vmem:[%s3704_s3 + $0x1a4] ss:$16 sps:$4 sm:$0xff]  }
  0x14   :  { %968 = vmatprep.subr.bf16.mxu0 %v2429_v22  ;;  %1050 = vmatprep.subr.bf16.mxu1 %v2432_v24  ;;  %v2478_v59 = vld [vmem:[%s3704_s3 + $0x188] ss:$16 sps:$4 sm:$0xff]   ;;  %v2486_v60 = vld [vmem:[%s3704_s3 + $0x1ac] ss:$16 sps:$4 sm:$0xff]   ;;  %v2481_v61 = vld [vmem:[%s3704_s3 + $0x1a0] ss:$16 sps:$4 sm:$0xff]  }
  0x15   :  { %v2484_v62 = vld [vmem:[%s3704_s3 + $0x1a8] ss:$16 sps:$4 sm:$0xff]   ;;  %v2489_v63 = vld [vmem:[%s3704_s3 + $0x1c4] ss:$16 sps:$4 sm:$0xff]   ;;  %v2492_v0 = vld [vmem:[%s3704_s3 + $0x1cc] ss:$16 sps:$4 sm:$0xff]  }
  0x16   :  { %v2487_v1 = vld [vmem:[%s3704_s3 + $0x1c0] ss:$16 sps:$4 sm:$0xff]   ;;  %v2490_v2 = vld [vmem:[%s3704_s3 + $0x1c8] ss:$16 sps:$4 sm:$0xff]   ;;  %v2495_v3 = vld [vmem:[%s3704_s3 + $0x1e4] ss:$16 sps:$4 sm:$0xff]  }
  0x17   :  { %969 = vmatpush1.bf16.msra.mxu0 %v2427_v25  ;;  %1051 = vmatpush1.bf16.msra.mxu1 %v2430_v27  ;;  %v2498_v4 = vld [vmem:[%s3704_s3 + $0x1ec] ss:$16 sps:$4 sm:$0xff]   ;;  %v2493_v5 = vld [vmem:[%s3704_s3 + $0x1e0] ss:$16 sps:$4 sm:$0xff]   ;;  %v2496_v6 = vld [vmem:[%s3704_s3 + $0x1e8] ss:$16 sps:$4 sm:$0xff]  }
  0x18   :  { %970 = vmatprep.subr.bf16.mxu0 %v2435_v26  ;;  %1052 = vmatprep.subr.bf16.mxu1 %v2438_v28  ;;  %v2501_v7 = vld [vmem:[%s3704_s3 + $0x204] ss:$16 sps:$4 sm:$0xff]   ;;  %v2504_v8 = vld [vmem:[%s3704_s3 + $0x20c] ss:$16 sps:$4 sm:$0xff]  }
  0x1b   :  { %971 = vmatpush1.bf16.msra.mxu0 %v2433_v29  ;;  %1053 = vmatpush1.bf16.msra.mxu1 %v2436_v31 }
  0x1c   :  { %972 = vmatprep.subr.bf16.mxu0 %v2441_v30  ;;  %1054 = vmatprep.subr.bf16.mxu1 %v2444_v32 }
  0x1f   :  { %973 = vmatpush1.bf16.msra.mxu0 %v2439_v33  ;;  %1055 = vmatpush1.bf16.msra.mxu1 %v2442_v35 }
  0x20   :  { %974 = vmatprep.subr.bf16.mxu0 %v2447_v34  ;;  %1056 = vmatprep.subr.bf16.mxu1 %v2450_v36 }
  0x23   :  { %975 = vmatpush1.bf16.msra.mxu0 %v2445_v37  ;;  %1057 = vmatpush1.bf16.msra.mxu1 %v2448_v39 }
  0x24   :  { %976 = vmatprep.subr.bf16.mxu0 %v2453_v38  ;;  %1058 = vmatprep.subr.bf16.mxu1 %v2456_v40 }
  0x27   :  { %977 = vmatpush1.bf16.msra.mxu0 %v2451_v41  ;;  %1059 = vmatpush1.bf16.msra.mxu1 %v2454_v43 }
  0x28   :  { %978 = vmatprep.subr.bf16.mxu0 %v2459_v42  ;;  %1060 = vmatprep.subr.bf16.mxu1 %v2462_v45 }
  0x2b   :  { %979 = vmatpush1.bf16.msra.mxu0 %v2457_v44  ;;  %1061 = vmatpush1.bf16.msra.mxu1 %v2460_v46 }
  0x2c   :  { %980 = vmatprep.subr.bf16.mxu0 %v2465_v47  ;;  %1062 = vmatprep.subr.bf16.mxu1 %v2468_v48 }
  0x2f   :  { %981 = vmatpush1.bf16.msra.mxu0 %v2463_v49  ;;  %1063 = vmatpush1.bf16.msra.mxu1 %v2466_v51 }
  0x30   :  { %982 = vmatprep.subr.bf16.mxu0 %v2471_v50  ;;  %1064 = vmatprep.subr.bf16.mxu1 %v2474_v52 }
  0x33   :  { %983 = vmatpush1.bf16.msra.mxu0 %v2469_v53  ;;  %1065 = vmatpush1.bf16.msra.mxu1 %v2472_v55 }
  0x34   :  { %984 = vmatprep.subr.bf16.mxu0 %v2477_v54  ;;  %1066 = vmatprep.subr.bf16.mxu1 %v2480_v56 }
  0x37   :  { %985 = vmatpush1.bf16.msra.mxu0 %v2475_v57  ;;  %1067 = vmatpush1.bf16.msra.mxu1 %v2478_v59 }
  0x38   :  { %986 = vmatprep.subr.bf16.mxu0 %v2483_v58  ;;  %1068 = vmatprep.subr.bf16.mxu1 %v2486_v60 }
  0x3b   :  { %987 = vmatpush1.bf16.msra.mxu0 %v2481_v61  ;;  %1069 = vmatpush1.bf16.msra.mxu1 %v2484_v62 }
  0x3c   :  { %988 = vmatprep.subr.bf16.mxu0 %v2489_v63  ;;  %1070 = vmatprep.subr.bf16.mxu1 %v2492_v0 }
  0x3f   :  { %989 = vmatpush1.bf16.msra.mxu0 %v2487_v1  ;;  %1071 = vmatpush1.bf16.msra.mxu1 %v2490_v2 }
  0x40   :  { %990 = vmatprep.subr.bf16.mxu0 %v2495_v3  ;;  %1072 = vmatprep.subr.bf16.mxu1 %v2498_v4 }
  0x43   :  { %991 = vmatpush1.bf16.msra.mxu0 %v2493_v5  ;;  %1073 = vmatpush1.bf16.msra.mxu1 %v2496_v6 }
  0x44   :  { %1001 = vmatprep.subr.bf16.mxu0 %v2501_v7  ;;  %1083 = vmatprep.subr.bf16.mxu1 %v2504_v8 }
  0x45   :  { %12 = vsyncpa [#allocation3], 0  ;;  %v36_v9 = vlaneseq  ;;  %v3074_v12 = vld [vmem:[%s3703_s2] sm:$0xf]  ;;  %v2502_v33 = vld [vmem:[%s3704_s3 + $0x208] ss:$16 sps:$4 sm:$0xff]  }
  0x46   :  { %v2499_v32 = vld [vmem:[%s3704_s3 + $0x200] ss:$16 sps:$4 sm:$0xff]   ;;  %v2507_v36 = vld [vmem:[%s3704_s3 + $0x224] ss:$16 sps:$4 sm:$0xff]   ;;  %v2510_v37 = vld [vmem:[%s3704_s3 + $0x22c] ss:$16 sps:$4 sm:$0xff]  }
  0x47   :  { %v3066_v10 = vshrl.u32 %v36_v9, 7  ;;  %v2505_v39 = vld [vmem:[%s3704_s3 + $0x220] ss:$16 sps:$4 sm:$0xff]   ;;  %v2508_v40 = vld [vmem:[%s3704_s3 + $0x228] ss:$16 sps:$4 sm:$0xff]   ;;  %vm2093_vm1 = vcmask 949248  }
  0x48   :  { %v2513_v41 = vld [vmem:[%s3704_s3 + $0x244] ss:$16 sps:$4 sm:$0xff]   ;;  %v2516_v42 = vld [vmem:[%s3704_s3 + $0x24c] ss:$16 sps:$4 sm:$0xff]   ;;  %v2511_v43 = vld [vmem:[%s3704_s3 + $0x240] ss:$16 sps:$4 sm:$0xff]  }
  0x49   :  { %v3069_v11 = vsub.s32 0, %v3066_v10  ;;  %v3077_v13 = vsub.s32 1, %v3066_v10  ;;  %v3080_v14 = vsub.s32 3, %v3066_v10  ;;  %v2514_v44 = vld [vmem:[%s3704_s3 + $0x248] ss:$16 sps:$4 sm:$0xff]  }
  0x4a   :  { %v2519_v45 = vld [vmem:[%s3704_s3 + $0x264] ss:$16 sps:$4 sm:$0xff]   ;;  %v2522_v46 = vld [vmem:[%s3704_s3 + $0x26c] ss:$16 sps:$4 sm:$0xff]   ;;  %v2517_v47 = vld [vmem:[%s3704_s3 + $0x260] ss:$16 sps:$4 sm:$0xff]  }
  0x4b   :  { %v39_v15 = vrot.slane %v3074_v12, %v3069_v11  ;;  %v43_v16 = vrot.slane %v3074_v12, %v3077_v13  ;;  %v51_v18 = vrot.slane %v3074_v12, %v3080_v14  ;;  %v2520_v48 = vld [vmem:[%s3704_s3 + $0x268] ss:$16 sps:$4 sm:$0xff]   ;;  %v2525_v49 = vld [vmem:[%s3704_s3 + $0x284] ss:$16 sps:$4 sm:$0xff]   ;;  %v2528_v50 = vld [vmem:[%s3704_s3 + $0x28c] ss:$16 sps:$4 sm:$0xff]  }
  0x4c   :  { %v2523_v51 = vld [vmem:[%s3704_s3 + $0x280] ss:$16 sps:$4 sm:$0xff]   ;;  %v2526_v52 = vld [vmem:[%s3704_s3 + $0x288] ss:$16 sps:$4 sm:$0xff]   ;;  %v2531_v53 = vld [vmem:[%s3704_s3 + $0x2a4] ss:$16 sps:$4 sm:$0xff]  }
  0x4d   :  { %v2534_v54 = vld [vmem:[%s3704_s3 + $0x2ac] ss:$16 sps:$4 sm:$0xff]   ;;  %v2529_v55 = vld [vmem:[%s3704_s3 + $0x2a0] ss:$16 sps:$4 sm:$0xff]   ;;  %v2532_v56 = vld [vmem:[%s3704_s3 + $0x2a8] ss:$16 sps:$4 sm:$0xff]  }
  0x4e   :  { %v2537_v57 = vld [vmem:[%s3704_s3 + $0x2c4] ss:$16 sps:$4 sm:$0xff]   ;;  %v2540_v58 = vld [vmem:[%s3704_s3 + $0x2cc] ss:$16 sps:$4 sm:$0xff]   ;;  %v2535_v59 = vld [vmem:[%s3704_s3 + $0x2c0] ss:$16 sps:$4 sm:$0xff]  }
  0x4f   :  { %v2538_v60 = vld [vmem:[%s3704_s3 + $0x2c8] ss:$16 sps:$4 sm:$0xff]   ;;  %v2543_v61 = vld [vmem:[%s3704_s3 + $0x2e4] ss:$16 sps:$4 sm:$0xff]   ;;  %v2546_v62 = vld [vmem:[%s3704_s3 + $0x2ec] ss:$16 sps:$4 sm:$0xff]  }
  0x50   :  { %v2541_v63 = vld [vmem:[%s3704_s3 + $0x2e0] ss:$16 sps:$4 sm:$0xff]   ;;  %v2544_v0 = vld [vmem:[%s3704_s3 + $0x2e8] ss:$16 sps:$4 sm:$0xff]   ;;  %v2549_v1 = vld [vmem:[%s3704_s3 + $0x304] ss:$16 sps:$4 sm:$0xff]  }
  0x51   :  { %v2552_v2 = vld [vmem:[%s3704_s3 + $0x30c] ss:$16 sps:$4 sm:$0xff]   ;;  %v2547_v3 = vld [vmem:[%s3704_s3 + $0x300] ss:$16 sps:$4 sm:$0xff]   ;;  %v2550_v4 = vld [vmem:[%s3704_s3 + $0x308] ss:$16 sps:$4 sm:$0xff]  }
  0x52   :  { %v2555_v5 = vld [vmem:[%s3704_s3 + $0x324] ss:$16 sps:$4 sm:$0xff]   ;;  %v2558_v6 = vld [vmem:[%s3704_s3 + $0x32c] ss:$16 sps:$4 sm:$0xff]   ;;  %v2553_v7 = vld [vmem:[%s3704_s3 + $0x320] ss:$16 sps:$4 sm:$0xff]  }
  0x53   :  { %v2556_v8 = vld [vmem:[%s3704_s3 + $0x328] ss:$16 sps:$4 sm:$0xff]   ;;  %v2561_v9 = vld [vmem:[%s3704_s3 + $0x344] ss:$16 sps:$4 sm:$0xff]  }
  0xd9   :  { %v114_v17 = vpop.f32.mrb[0].mxu0  ;;  %v3088_v23 = vpop.f32.mrb[0].mxu1 }
  0xda   :  { %v115_v19 = vadd.f32 %v114_v17, %v39_v15  ;;  %v116_v20 = vpop.f32.mrb[1].mxu0  ;;  %v157_v26 = vpop.f32.mrb[1].mxu1  ;;  %v2564_v15 = vld [vmem:[%s3704_s3 + $0x34c] ss:$16 sps:$4 sm:$0xff]   ;;  %v2562_v17 = vld [vmem:[%s3704_s3 + $0x348] ss:$16 sps:$4 sm:$0xff]  }
  0xdb   :  { %v117_v21 = vadd.f32 %v116_v20, %v43_v16  ;;  %v118_v22 = vpop.f32.mrb[2].mxu0  ;;  %v158_v28 = vadd.f32 %v157_v26, %v51_v18  ;;  %v159_v29 = vpop.f32.mrb[2].mxu1  ;;  %v2559_v16 = vld [vmem:[%s3704_s3 + $0x340] ss:$16 sps:$4 sm:$0xff]   ;;  %v2567_v18 = vld [vmem:[%s3704_s3 + $0x364] ss:$16 sps:$4 sm:$0xff]  }
  0xdc   :  { %v162_v24 = vmax.f32 %v115_v19, 0.0  ;;  %v119_v25 = vpop.f32.mrb[3].mxu0  ;;  %v160_v30 = vpop.f32.mrb[3].mxu1  ;;  %v2570_v19 = vld [vmem:[%s3704_s3 + $0x36c] ss:$16 sps:$4 sm:$0xff]  }
  0xdd   :  { %v163_v27 = vmax.f32 %v117_v21, 0.0  ;;  %v165_v34 = vmax.f32 %v158_v28, 0.0  ;;  %v2565_v20 = vld [vmem:[%s3704_s3 + $0x360] ss:$16 sps:$4 sm:$0xff]   ;;  %v2568_v21 = vld [vmem:[%s3704_s3 + $0x368] ss:$16 sps:$4 sm:$0xff]  }
  0xde   :  { %v166_v35 = vpack.c.bf16 %v162_v24, %v162_v24  ;;  %v2573_v22 = vld [vmem:[%s3704_s3 + $0x384] ss:$16 sps:$4 sm:$0xff]   ;;  %v2576_v24 = vld [vmem:[%s3704_s3 + $0x38c] ss:$16 sps:$4 sm:$0xff]   ;;  %v2571_v25 = vld [vmem:[%s3704_s3 + $0x380] ss:$16 sps:$4 sm:$0xff]  }
  0xdf   :  { %v167_v31 = vpack.c.bf16 %v163_v27, %v163_v27  ;;  %v169_v38 = vpack.c.bf16 %v165_v34, %v165_v34  ;;  %v2574_v26 = vld [vmem:[%s3704_s3 + $0x388] ss:$16 sps:$4 sm:$0xff]   ;;  %v3241_v27 = vsub.s32 2, %v3066_v10  ;;  %v2579_v28 = vld [vmem:[%s3704_s3 + $0x3a4] ss:$16 sps:$4 sm:$0xff]  }
  0xe0   :  { %v2582_v29 = vld [vmem:[%s3704_s3 + $0x3ac] ss:$16 sps:$4 sm:$0xff]   ;;  %v2577_v30 = vld [vmem:[%s3704_s3 + $0x3a0] ss:$16 sps:$4 sm:$0xff]  }
  0xe1   :  { %992 = vmatprep.mubr.bf16.mxu0 %v167_v31  ;;  %1074 = vmatprep.mubr.bf16.mxu1 %v167_v31  ;;  %v2580_v31 = vld [vmem:[%s3704_s3 + $0x3a8] ss:$16 sps:$4 sm:$0xff]   ;;  %v47_v10 = vrot.slane %v3074_v12, %v3241_v27  ;;  %v2583_v34 = vld [vmem:[%s3704_s3 + $0x3c0] ss:$16 sps:$4 sm:$0xff]  }
  0xe2   :  { %993 = vmatmul.mubr.bf16.vlgmr.msra.gmra.mrb[4].mxu0 %v166_v35  ;;  %1075 = vmatmul.mubr.bf16.vlgmr.msra.gmra.mrb[4].mxu1 %v166_v35  ;;  %v2586_v12 = vld [vmem:[%s3704_s3 + $0x3c8] ss:$16 sps:$4 sm:$0xff]  }
  0xe3   :  { %1002 = vmatpush1.bf16.msra.mxu0 %v2499_v32  ;;  %1084 = vmatpush1.bf16.msra.mxu1 %v2502_v33  ;;  %v2585_v32 = vld [vmem:[%s3704_s3 + $0x3c4] ss:$16 sps:$4 sm:$0xff]   ;;  %v2588_v33 = vld [vmem:[%s3704_s3 + $0x3cc] ss:$16 sps:$4 sm:$0xff]   ;;  %v156_v35 = vadd.f32 %v3088_v23, %v47_v10  ;;  %v2592_v23 = vld [vmem:[%s3704_s3 + $0x3e8] ss:$16 sps:$4 sm:$0xff]  }
  0xe4   :  { %1003 = vmatprep.subr.bf16.mxu0 %v2507_v36  ;;  %1085 = vmatprep.subr.bf16.mxu1 %v2510_v37  ;;  %v2591_v36 = vld [vmem:[%s3704_s3 + $0x3e4] ss:$16 sps:$4 sm:$0xff]   ;;  %v2594_v37 = vld [vmem:[%s3704_s3 + $0x3ec] ss:$16 sps:$4 sm:$0xff]  }
  0xe5   :  { %1033 = vmatprep.mubr.bf16.mxu0 %v169_v38  ;;  %1115 = vmatprep.mubr.bf16.mxu1 %v169_v38  ;;  %v2589_v38 = vld [vmem:[%s3704_s3 + $0x3e0] ss:$16 sps:$4 sm:$0xff]   ;;  %v2669_v10 = vld [vmem:[%s3706_s5 + $0x184] ss:$16 sps:$4 sm:$0xff]  }
  0xe7   :  { %1004 = vmatpush1.bf16.msra.mxu0 %v2505_v39  ;;  %1086 = vmatpush1.bf16.msra.mxu1 %v2508_v40  ;;  %v164_v39 = vmax.f32 %v156_v35, 0.0  ;;  %v2597_v40 = vld [vmem:[%s3706_s5 + $0x4] ss:$16 sps:$4 sm:$0xff]   ;;  %v2678_v35 = vld [vmem:[%s3706_s5 + $0x1ac] ss:$16 sps:$4 sm:$0xff]  }
  0xe8   :  { %1005 = vmatprep.subr.bf16.mxu0 %v2513_v41  ;;  %1087 = vmatprep.subr.bf16.mxu1 %v2516_v42  ;;  %v2600_v41 = vld [vmem:[%s3706_s5 + $0xc] ss:$16 sps:$4 sm:$0xff]   ;;  %v2595_v42 = vld [vmem:[%s3706_s5] ss:$16 sps:$4 sm:$0xff]  }
  0xeb   :  { %1006 = vmatpush1.bf16.msra.mxu0 %v2511_v43  ;;  %1088 = vmatpush1.bf16.msra.mxu1 %v2514_v44  ;;  %v2598_v43 = vld [vmem:[%s3706_s5 + $0x8] ss:$16 sps:$4 sm:$0xff]   ;;  %v168_v44 = vpack.c.bf16 %v164_v39, %v164_v39  ;;  %v2679_v39 = vld [vmem:[%s3706_s5 + $0x1c0] ss:$16 sps:$4 sm:$0xff]  }
  0xec   :  { %1007 = vmatprep.subr.bf16.mxu0 %v2519_v45  ;;  %1089 = vmatprep.subr.bf16.mxu1 %v2522_v46  ;;  %v2603_v45 = vld [vmem:[%s3706_s5 + $0x24] ss:$16 sps:$4 sm:$0xff]   ;;  %v2606_v46 = vld [vmem:[%s3706_s5 + $0x2c] ss:$16 sps:$4 sm:$0xff]  }
  0xef   :  { %1008 = vmatpush1.bf16.msra.mxu0 %v2517_v47  ;;  %1090 = vmatpush1.bf16.msra.mxu1 %v2520_v48  ;;  %v2601_v47 = vld [vmem:[%s3706_s5 + $0x20] ss:$16 sps:$4 sm:$0xff]   ;;  %v2604_v48 = vld [vmem:[%s3706_s5 + $0x28] ss:$16 sps:$4 sm:$0xff]  }
  0xf0   :  { %1009 = vmatprep.subr.bf16.mxu0 %v2525_v49  ;;  %1091 = vmatprep.subr.bf16.mxu1 %v2528_v50  ;;  %v2609_v49 = vld [vmem:[%s3706_s5 + $0x44] ss:$16 sps:$4 sm:$0xff]   ;;  %v2612_v50 = vld [vmem:[%s3706_s5 + $0x4c] ss:$16 sps:$4 sm:$0xff]  }
  0xf3   :  { %1010 = vmatpush1.bf16.msra.mxu0 %v2523_v51  ;;  %1092 = vmatpush1.bf16.msra.mxu1 %v2526_v52  ;;  %v2607_v51 = vld [vmem:[%s3706_s5 + $0x40] ss:$16 sps:$4 sm:$0xff]   ;;  %v2610_v52 = vld [vmem:[%s3706_s5 + $0x48] ss:$16 sps:$4 sm:$0xff]  }
  0xf4   :  { %1011 = vmatprep.subr.bf16.mxu0 %v2531_v53  ;;  %1093 = vmatprep.subr.bf16.mxu1 %v2534_v54  ;;  %v2615_v53 = vld [vmem:[%s3706_s5 + $0x64] ss:$16 sps:$4 sm:$0xff]   ;;  %v2618_v54 = vld [vmem:[%s3706_s5 + $0x6c] ss:$16 sps:$4 sm:$0xff]  }
  0xf7   :  { %1012 = vmatpush1.bf16.msra.mxu0 %v2529_v55  ;;  %1094 = vmatpush1.bf16.msra.mxu1 %v2532_v56  ;;  %v2613_v55 = vld [vmem:[%s3706_s5 + $0x60] ss:$16 sps:$4 sm:$0xff]   ;;  %v2616_v56 = vld [vmem:[%s3706_s5 + $0x68] ss:$16 sps:$4 sm:$0xff]  }
  0xf8   :  { %1013 = vmatprep.subr.bf16.mxu0 %v2537_v57  ;;  %1095 = vmatprep.subr.bf16.mxu1 %v2540_v58  ;;  %v2621_v57 = vld [vmem:[%s3706_s5 + $0x84] ss:$16 sps:$4 sm:$0xff]   ;;  %v2624_v58 = vld [vmem:[%s3706_s5 + $0x8c] ss:$16 sps:$4 sm:$0xff]  }
  0xfb   :  { %1014 = vmatpush1.bf16.msra.mxu0 %v2535_v59  ;;  %1096 = vmatpush1.bf16.msra.mxu1 %v2538_v60  ;;  %v2619_v59 = vld [vmem:[%s3706_s5 + $0x80] ss:$16 sps:$4 sm:$0xff]   ;;  %v2622_v60 = vld [vmem:[%s3706_s5 + $0x88] ss:$16 sps:$4 sm:$0xff]  }
  0xfc   :  { %1015 = vmatprep.subr.bf16.mxu0 %v2543_v61  ;;  %1097 = vmatprep.subr.bf16.mxu1 %v2546_v62  ;;  %v2627_v61 = vld [vmem:[%s3706_s5 + $0xa4] ss:$16 sps:$4 sm:$0xff]   ;;  %v2630_v62 = vld [vmem:[%s3706_s5 + $0xac] ss:$16 sps:$4 sm:$0xff]  }
  0xff   :  { %1016 = vmatpush1.bf16.msra.mxu0 %v2541_v63  ;;  %1098 = vmatpush1.bf16.msra.mxu1 %v2544_v0  ;;  %v2625_v63 = vld [vmem:[%s3706_s5 + $0xa0] ss:$16 sps:$4 sm:$0xff]   ;;  %v2628_v0 = vld [vmem:[%s3706_s5 + $0xa8] ss:$16 sps:$4 sm:$0xff]  }
 0x100   :  { %1017 = vmatprep.subr.bf16.mxu0 %v2549_v1  ;;  %1099 = vmatprep.subr.bf16.mxu1 %v2552_v2  ;;  %v2633_v1 = vld [vmem:[%s3706_s5 + $0xc4] ss:$16 sps:$4 sm:$0xff]   ;;  %v2636_v2 = vld [vmem:[%s3706_s5 + $0xcc] ss:$16 sps:$4 sm:$0xff]  }
 0x103   :  { %1018 = vmatpush1.bf16.msra.mxu0 %v2547_v3  ;;  %1100 = vmatpush1.bf16.msra.mxu1 %v2550_v4  ;;  %v2631_v3 = vld [vmem:[%s3706_s5 + $0xc0] ss:$16 sps:$4 sm:$0xff]   ;;  %v2634_v4 = vld [vmem:[%s3706_s5 + $0xc8] ss:$16 sps:$4 sm:$0xff]  }
 0x104   :  { %1019 = vmatprep.subr.bf16.mxu0 %v2555_v5  ;;  %1101 = vmatprep.subr.bf16.mxu1 %v2558_v6  ;;  %v2639_v5 = vld [vmem:[%s3706_s5 + $0xe4] ss:$16 sps:$4 sm:$0xff]   ;;  %v2642_v6 = vld [vmem:[%s3706_s5 + $0xec] ss:$16 sps:$4 sm:$0xff]  }
 0x107   :  { %1020 = vmatpush1.bf16.msra.mxu0 %v2553_v7  ;;  %1102 = vmatpush1.bf16.msra.mxu1 %v2556_v8  ;;  %v2637_v7 = vld [vmem:[%s3706_s5 + $0xe0] ss:$16 sps:$4 sm:$0xff]   ;;  %v2640_v8 = vld [vmem:[%s3706_s5 + $0xe8] ss:$16 sps:$4 sm:$0xff]  }
 0x108   :  { %1021 = vmatprep.subr.bf16.mxu0 %v2561_v9  ;;  %1103 = vmatprep.subr.bf16.mxu1 %v2564_v15  ;;  %v2645_v9 = vld [vmem:[%s3706_s5 + $0x104] ss:$16 sps:$4 sm:$0xff]   ;;  %v2648_v15 = vld [vmem:[%s3706_s5 + $0x10c] ss:$16 sps:$4 sm:$0xff]  }
 0x10b   :  { %1022 = vmatpush1.bf16.msra.mxu0 %v2559_v16  ;;  %1104 = vmatpush1.bf16.msra.mxu1 %v2562_v17  ;;  %v2643_v16 = vld [vmem:[%s3706_s5 + $0x100] ss:$16 sps:$4 sm:$0xff]   ;;  %v2646_v17 = vld [vmem:[%s3706_s5 + $0x108] ss:$16 sps:$4 sm:$0xff]  }
 0x10c   :  { %1023 = vmatprep.subr.bf16.mxu0 %v2567_v18  ;;  %1105 = vmatprep.subr.bf16.mxu1 %v2570_v19  ;;  %v2651_v18 = vld [vmem:[%s3706_s5 + $0x124] ss:$16 sps:$4 sm:$0xff]   ;;  %v2654_v19 = vld [vmem:[%s3706_s5 + $0x12c] ss:$16 sps:$4 sm:$0xff]  }
 0x10f   :  { %1024 = vmatpush1.bf16.msra.mxu0 %v2565_v20  ;;  %1106 = vmatpush1.bf16.msra.mxu1 %v2568_v21  ;;  %v2649_v20 = vld [vmem:[%s3706_s5 + $0x120] ss:$16 sps:$4 sm:$0xff]   ;;  %v2652_v21 = vld [vmem:[%s3706_s5 + $0x128] ss:$16 sps:$4 sm:$0xff]  }
 0x110   :  { %1025 = vmatprep.subr.bf16.mxu0 %v2573_v22  ;;  %1107 = vmatprep.subr.bf16.mxu1 %v2576_v24  ;;  %v2657_v22 = vld [vmem:[%s3706_s5 + $0x144] ss:$16 sps:$4 sm:$0xff]   ;;  %v2660_v24 = vld [vmem:[%s3706_s5 + $0x14c] ss:$16 sps:$4 sm:$0xff]  }
 0x113   :  { %1026 = vmatpush1.bf16.msra.mxu0 %v2571_v25  ;;  %1108 = vmatpush1.bf16.msra.mxu1 %v2574_v26  ;;  %v2655_v25 = vld [vmem:[%s3706_s5 + $0x140] ss:$16 sps:$4 sm:$0xff]   ;;  %v2658_v26 = vld [vmem:[%s3706_s5 + $0x148] ss:$16 sps:$4 sm:$0xff]  }
 0x114   :  { %1027 = vmatprep.subr.bf16.mxu0 %v2579_v28  ;;  %1109 = vmatprep.subr.bf16.mxu1 %v2582_v29  ;;  %v2663_v28 = vld [vmem:[%s3706_s5 + $0x164] ss:$16 sps:$4 sm:$0xff]   ;;  %v2666_v29 = vld [vmem:[%s3706_s5 + $0x16c] ss:$16 sps:$4 sm:$0xff]  }
 0x117   :  { %1028 = vmatpush1.bf16.msra.mxu0 %v2577_v30  ;;  %1110 = vmatpush1.bf16.msra.mxu1 %v2580_v31  ;;  %v2661_v30 = vld [vmem:[%s3706_s5 + $0x160] ss:$16 sps:$4 sm:$0xff]   ;;  %v2664_v31 = vld [vmem:[%s3706_s5 + $0x168] ss:$16 sps:$4 sm:$0xff]  }
 0x118   :  { %1029 = vmatprep.subr.bf16.mxu0 %v2585_v32  ;;  %1111 = vmatprep.subr.bf16.mxu1 %v2588_v33  ;;  %v2672_v32 = vld [vmem:[%s3706_s5 + $0x18c] ss:$16 sps:$4 sm:$0xff]   ;;  %v2667_v33 = vld [vmem:[%s3706_s5 + $0x180] ss:$16 sps:$4 sm:$0xff]  }
 0x11b   :  { %1030 = vmatpush1.bf16.msra.mxu0 %v2583_v34  ;;  %1112 = vmatpush1.bf16.msra.mxu1 %v2586_v12  ;;  %v2670_v34 = vld [vmem:[%s3706_s5 + $0x188] ss:$16 sps:$4 sm:$0xff]   ;;  %v2675_v12 = vld [vmem:[%s3706_s5 + $0x1a4] ss:$16 sps:$4 sm:$0xff]  }
 0x11c   :  { %1031 = vmatprep.subr.bf16.mxu0 %v2591_v36  ;;  %1113 = vmatprep.subr.bf16.mxu1 %v2594_v37  ;;  %v2673_v36 = vld [vmem:[%s3706_s5 + $0x1a0] ss:$16 sps:$4 sm:$0xff]   ;;  %v2676_v37 = vld [vmem:[%s3706_s5 + $0x1a8] ss:$16 sps:$4 sm:$0xff]  }
 0x11f   :  { %1032 = vmatpush1.bf16.msra.mxu0 %v2589_v38  ;;  %1114 = vmatpush1.bf16.msra.mxu1 %v2592_v23  ;;  %v2681_v38 = vld [vmem:[%s3706_s5 + $0x1c4] ss:$16 sps:$4 sm:$0xff]   ;;  %v2684_v23 = vld [vmem:[%s3706_s5 + $0x1cc] ss:$16 sps:$4 sm:$0xff]  }
 0x120   :  { %1922 = vmatprep.subr.bf16.mxu0 %v2597_v40  ;;  %2004 = vmatprep.subr.bf16.mxu1 %v2600_v41  ;;  %v2682_v40 = vld [vmem:[%s3706_s5 + $0x1c8] ss:$16 sps:$4 sm:$0xff]   ;;  %v2687_v41 = vld [vmem:[%s3706_s5 + $0x1e4] ss:$16 sps:$4 sm:$0xff]  }
 0x122   :  { %1034 = vmatmul.mubr.bf16.vlgmr.msra.gmra.mrb[4].mxu0 %v168_v44  ;;  %1116 = vmatmul.mubr.bf16.vlgmr.msra.gmra.mrb[4].mxu1 %v168_v44  ;;  %v2688_v44 = vld [vmem:[%s3706_s5 + $0x1e8] ss:$16 sps:$4 sm:$0xff]  }
 0x123   :  { %1923 = vmatpush1.bf16.msra.mxu0 %v2595_v42  ;;  %2005 = vmatpush1.bf16.msra.mxu1 %v2598_v43  ;;  %v2690_v42 = vld [vmem:[%s3706_s5 + $0x1ec] ss:$16 sps:$4 sm:$0xff]   ;;  %v2685_v43 = vld [vmem:[%s3706_s5 + $0x1e0] ss:$16 sps:$4 sm:$0xff]  }
 0x124   :  { %1924 = vmatprep.subr.bf16.mxu0 %v2603_v45  ;;  %2006 = vmatprep.subr.bf16.mxu1 %v2606_v46  ;;  %v2693_v45 = vld [vmem:[%s3706_s5 + $0x204] ss:$16 sps:$4 sm:$0xff]   ;;  %v2696_v46 = vld [vmem:[%s3706_s5 + $0x20c] ss:$16 sps:$4 sm:$0xff]  }
 0x127   :  { %1925 = vmatpush1.bf16.msra.mxu0 %v2601_v47  ;;  %2007 = vmatpush1.bf16.msra.mxu1 %v2604_v48  ;;  %v3483_v47 = vld [vmem:[%s3705_s4] sm:$0xf] }
 0x128   :  { %1926 = vmatprep.subr.bf16.mxu0 %v2609_v49  ;;  %2008 = vmatprep.subr.bf16.mxu1 %v2612_v50  ;;  %v303_v48 = vrot.slane %v3483_v47, %v3069_v11  ;;  %v307_v49 = vrot.slane %v3483_v47, %v3077_v13  ;;  %v315_v50 = vrot.slane %v3483_v47, %v3080_v14 }
 0x12b   :  { %1927 = vmatpush1.bf16.msra.mxu0 %v2607_v51  ;;  %2009 = vmatpush1.bf16.msra.mxu1 %v2610_v52 }
 0x12c   :  { %1928 = vmatprep.subr.bf16.mxu0 %v2615_v53  ;;  %2010 = vmatprep.subr.bf16.mxu1 %v2618_v54 }
 0x12f   :  { %1929 = vmatpush1.bf16.msra.mxu0 %v2613_v55  ;;  %2011 = vmatpush1.bf16.msra.mxu1 %v2616_v56 }
 0x130   :  { %1930 = vmatprep.subr.bf16.mxu0 %v2621_v57  ;;  %2012 = vmatprep.subr.bf16.mxu1 %v2624_v58 }
 0x133   :  { %1931 = vmatpush1.bf16.msra.mxu0 %v2619_v59  ;;  %2013 = vmatpush1.bf16.msra.mxu1 %v2622_v60 }
 0x134   :  { %1932 = vmatprep.subr.bf16.mxu0 %v2627_v61  ;;  %2014 = vmatprep.subr.bf16.mxu1 %v2630_v62 }
 0x137   :  { %1933 = vmatpush1.bf16.msra.mxu0 %v2625_v63  ;;  %2015 = vmatpush1.bf16.msra.mxu1 %v2628_v0 }
 0x138   :  { %1934 = vmatprep.subr.bf16.mxu0 %v2633_v1  ;;  %2016 = vmatprep.subr.bf16.mxu1 %v2636_v2  ;;  %v2691_v2 = vld [vmem:[%s3706_s5 + $0x200] ss:$16 sps:$4 sm:$0xff]  }
 0x13b   :  { %1935 = vmatpush1.bf16.msra.mxu0 %v2631_v3  ;;  %2017 = vmatpush1.bf16.msra.mxu1 %v2634_v4  ;;  %v2694_v3 = vld [vmem:[%s3706_s5 + $0x208] ss:$16 sps:$4 sm:$0xff]  }
 0x13c   :  { %1936 = vmatprep.subr.bf16.mxu0 %v2639_v5  ;;  %2018 = vmatprep.subr.bf16.mxu1 %v2642_v6  ;;  %v2699_v5 = vld [vmem:[%s3706_s5 + $0x224] ss:$16 sps:$4 sm:$0xff]   ;;  %v2702_v6 = vld [vmem:[%s3706_s5 + $0x22c] ss:$16 sps:$4 sm:$0xff]  }
 0x13f   :  { %1937 = vmatpush1.bf16.msra.mxu0 %v2637_v7  ;;  %2019 = vmatpush1.bf16.msra.mxu1 %v2640_v8  ;;  %v2697_v8 = vld [vmem:[%s3706_s5 + $0x220] ss:$16 sps:$4 sm:$0xff]  }
 0x140   :  { %1938 = vmatprep.subr.bf16.mxu0 %v2645_v9  ;;  %2020 = vmatprep.subr.bf16.mxu1 %v2648_v15  ;;  %v2700_v9 = vld [vmem:[%s3706_s5 + $0x228] ss:$16 sps:$4 sm:$0xff]   ;;  %v2705_v15 = vld [vmem:[%s3706_s5 + $0x244] ss:$16 sps:$4 sm:$0xff]  }
 0x143   :  { %1939 = vmatpush1.bf16.msra.mxu0 %v2643_v16  ;;  %2021 = vmatpush1.bf16.msra.mxu1 %v2646_v17  ;;  %v2708_v16 = vld [vmem:[%s3706_s5 + $0x24c] ss:$16 sps:$4 sm:$0xff]   ;;  %v2703_v17 = vld [vmem:[%s3706_s5 + $0x240] ss:$16 sps:$4 sm:$0xff]  }
 0x144   :  { %1940 = vmatprep.subr.bf16.mxu0 %v2651_v18  ;;  %2022 = vmatprep.subr.bf16.mxu1 %v2654_v19  ;;  %v2706_v18 = vld [vmem:[%s3706_s5 + $0x248] ss:$16 sps:$4 sm:$0xff]   ;;  %v2711_v19 = vld [vmem:[%s3706_s5 + $0x264] ss:$16 sps:$4 sm:$0xff]  }
 0x147   :  { %1941 = vmatpush1.bf16.msra.mxu0 %v2649_v20  ;;  %2023 = vmatpush1.bf16.msra.mxu1 %v2652_v21  ;;  %v2714_v20 = vld [vmem:[%s3706_s5 + $0x26c] ss:$16 sps:$4 sm:$0xff]   ;;  %v2709_v21 = vld [vmem:[%s3706_s5 + $0x260] ss:$16 sps:$4 sm:$0xff]  }
 0x148   :  { %1942 = vmatprep.subr.bf16.mxu0 %v2657_v22  ;;  %2024 = vmatprep.subr.bf16.mxu1 %v2660_v24  ;;  %v2712_v22 = vld [vmem:[%s3706_s5 + $0x268] ss:$16 sps:$4 sm:$0xff]   ;;  %v2717_v24 = vld [vmem:[%s3706_s5 + $0x284] ss:$16 sps:$4 sm:$0xff]  }
 0x14b   :  { %1943 = vmatpush1.bf16.msra.mxu0 %v2655_v25  ;;  %2025 = vmatpush1.bf16.msra.mxu1 %v2658_v26  ;;  %v2720_v25 = vld [vmem:[%s3706_s5 + $0x28c] ss:$16 sps:$4 sm:$0xff]   ;;  %v2715_v26 = vld [vmem:[%s3706_s5 + $0x280] ss:$16 sps:$4 sm:$0xff]  }
 0x14c   :  { %1944 = vmatprep.subr.bf16.mxu0 %v2663_v28  ;;  %2026 = vmatprep.subr.bf16.mxu1 %v2666_v29  ;;  %v2718_v28 = vld [vmem:[%s3706_s5 + $0x288] ss:$16 sps:$4 sm:$0xff]   ;;  %v2723_v29 = vld [vmem:[%s3706_s5 + $0x2a4] ss:$16 sps:$4 sm:$0xff]  }
 0x14f   :  { %1945 = vmatpush1.bf16.msra.mxu0 %v2661_v30  ;;  %2027 = vmatpush1.bf16.msra.mxu1 %v2664_v31  ;;  %v2726_v30 = vld [vmem:[%s3706_s5 + $0x2ac] ss:$16 sps:$4 sm:$0xff]   ;;  %v2721_v31 = vld [vmem:[%s3706_s5 + $0x2a0] ss:$16 sps:$4 sm:$0xff]  }
 0x150   :  { %1946 = vmatprep.subr.bf16.mxu0 %v2669_v10  ;;  %2028 = vmatprep.subr.bf16.mxu1 %v2672_v32  ;;  %v2724_v10 = vld [vmem:[%s3706_s5 + $0x2a8] ss:$16 sps:$4 sm:$0xff]   ;;  %v2729_v32 = vld [vmem:[%s3706_s5 + $0x2c4] ss:$16 sps:$4 sm:$0xff]  }
 0x153   :  { %1947 = vmatpush1.bf16.msra.mxu0 %v2667_v33  ;;  %2029 = vmatpush1.bf16.msra.mxu1 %v2670_v34  ;;  %v2732_v33 = vld [vmem:[%s3706_s5 + $0x2cc] ss:$16 sps:$4 sm:$0xff]   ;;  %v2727_v34 = vld [vmem:[%s3706_s5 + $0x2c0] ss:$16 sps:$4 sm:$0xff]  }
 0x154   :  { %1948 = vmatprep.subr.bf16.mxu0 %v2675_v12  ;;  %2030 = vmatprep.subr.bf16.mxu1 %v2678_v35  ;;  %v2730_v12 = vld [vmem:[%s3706_s5 + $0x2c8] ss:$16 sps:$4 sm:$0xff]   ;;  %v2735_v35 = vld [vmem:[%s3706_s5 + $0x2e4] ss:$16 sps:$4 sm:$0xff]  }
 0x157   :  { %1949 = vmatpush1.bf16.msra.mxu0 %v2673_v36  ;;  %2031 = vmatpush1.bf16.msra.mxu1 %v2676_v37  ;;  %v2738_v36 = vld [vmem:[%s3706_s5 + $0x2ec] ss:$16 sps:$4 sm:$0xff]   ;;  %v2733_v37 = vld [vmem:[%s3706_s5 + $0x2e0] ss:$16 sps:$4 sm:$0xff]  }
 0x158   :  { %1950 = vmatprep.subr.bf16.mxu0 %v2681_v38  ;;  %2032 = vmatprep.subr.bf16.mxu1 %v2684_v23  ;;  %v2736_v38 = vld [vmem:[%s3706_s5 + $0x2e8] ss:$16 sps:$4 sm:$0xff]   ;;  %v2741_v23 = vld [vmem:[%s3706_s5 + $0x304] ss:$16 sps:$4 sm:$0xff]  }
 0x15b   :  { %1951 = vmatpush1.bf16.msra.mxu0 %v2679_v39  ;;  %2033 = vmatpush1.bf16.msra.mxu1 %v2682_v40  ;;  %v2744_v39 = vld [vmem:[%s3706_s5 + $0x30c] ss:$16 sps:$4 sm:$0xff]   ;;  %v2739_v40 = vld [vmem:[%s3706_s5 + $0x300] ss:$16 sps:$4 sm:$0xff]  }
 0x15c   :  { %1952 = vmatprep.subr.bf16.mxu0 %v2687_v41  ;;  %2034 = vmatprep.subr.bf16.mxu1 %v2690_v42  ;;  %v2742_v41 = vld [vmem:[%s3706_s5 + $0x308] ss:$16 sps:$4 sm:$0xff]   ;;  %v2747_v42 = vld [vmem:[%s3706_s5 + $0x324] ss:$16 sps:$4 sm:$0xff]  }
 0x15f   :  { %1953 = vmatpush1.bf16.msra.mxu0 %v2685_v43  ;;  %2035 = vmatpush1.bf16.msra.mxu1 %v2688_v44  ;;  %v2750_v43 = vld [vmem:[%s3706_s5 + $0x32c] ss:$16 sps:$4 sm:$0xff]   ;;  %v2745_v44 = vld [vmem:[%s3706_s5 + $0x320] ss:$16 sps:$4 sm:$0xff]  }
 0x160   :  { %1963 = vmatprep.subr.bf16.mxu0 %v2693_v45  ;;  %2045 = vmatprep.subr.bf16.mxu1 %v2696_v46  ;;  %v2748_v45 = vld [vmem:[%s3706_s5 + $0x328] ss:$16 sps:$4 sm:$0xff]   ;;  %v2753_v46 = vld [vmem:[%s3706_s5 + $0x344] ss:$16 sps:$4 sm:$0xff]  }
 0x1f5   :  { %v1035_v51 = vpop.f32.mrb[4].mxu0  ;;  %v3491_v52 = vpop.f32.mrb[4].mxu1 }
 0x1f6   :  { %v2371_v53 = vadd.f32 %v1035_v51, %v303_v48  ;;  %v1037_v54 = vpop.f32.mrb[5].mxu0  ;;  %v1119_v55 = vpop.f32.mrb[5].mxu1  ;;  %v2756_v48 = vld [vmem:[%s3706_s5 + $0x34c] ss:$16 sps:$4 sm:$0xff]   ;;  %v2759_v51 = vld [vmem:[%s3706_s5 + $0x364] ss:$16 sps:$4 sm:$0xff]  }
 0x1f7   :  { %v2372_v56 = vadd.f32 %v1037_v54, %v307_v49  ;;  %v2374_v57 = vadd.f32 %v1119_v55, %v315_v50  ;;  %v1039_v58 = vpop.f32.mrb[6].mxu0  ;;  %v1121_v59 = vpop.f32.mrb[6].mxu1  ;;  %v2751_v49 = vld [vmem:[%s3706_s5 + $0x340] ss:$16 sps:$4 sm:$0xff]   ;;  %v2754_v50 = vld [vmem:[%s3706_s5 + $0x348] ss:$16 sps:$4 sm:$0xff]  }
 0x1f8   :  { %v1124_v60 = vmax.f32 %v2371_v53, 0.0  ;;  %v1040_v61 = vpop.f32.mrb[7].mxu0  ;;  %v1122_v62 = vpop.f32.mrb[7].mxu1  ;;  %v2762_v53 = vld [vmem:[%s3706_s5 + $0x36c] ss:$16 sps:$4 sm:$0xff]  }
 0x1f9   :  { %v1125_v63 = vmax.f32 %v2372_v56, 0.0  ;;  %v1127_v0 = vmax.f32 %v2374_v57, 0.0  ;;  %v2757_v54 = vld [vmem:[%s3706_s5 + $0x360] ss:$16 sps:$4 sm:$0xff]   ;;  %v2760_v55 = vld [vmem:[%s3706_s5 + $0x368] ss:$16 sps:$4 sm:$0xff]  }
 0x1fa   :  { %v1128_v4 = vpack.c.bf16 %v1124_v60, %v1124_v60  ;;  %v2765_v56 = vld [vmem:[%s3706_s5 + $0x384] ss:$16 sps:$4 sm:$0xff]   ;;  %v2768_v57 = vld [vmem:[%s3706_s5 + $0x38c] ss:$16 sps:$4 sm:$0xff]   ;;  %v2763_v58 = vld [vmem:[%s3706_s5 + $0x380] ss:$16 sps:$4 sm:$0xff]  }
 0x1fb   :  { %v1129_v1 = vpack.c.bf16 %v1125_v63, %v1125_v63  ;;  %v1131_v7 = vpack.c.bf16 %v1127_v0, %v1127_v0  ;;  %v2766_v59 = vld [vmem:[%s3706_s5 + $0x388] ss:$16 sps:$4 sm:$0xff]   ;;  %v2771_v60 = vld [vmem:[%s3706_s5 + $0x3a4] ss:$16 sps:$4 sm:$0xff]   ;;  %v2774_v61 = vld [vmem:[%s3706_s5 + $0x3ac] ss:$16 sps:$4 sm:$0xff]   ;;  %v311_v0 = vrot.slane %v3483_v47, %v3241_v27 }
 0x1fc   :  { %v2769_v62 = vld [vmem:[%s3706_s5 + $0x3a0] ss:$16 sps:$4 sm:$0xff]   ;;  %v2772_v63 = vld [vmem:[%s3706_s5 + $0x3a8] ss:$16 sps:$4 sm:$0xff]  }
 0x1fd   :  { %1954 = vmatprep.mubr.bf16.mxu0 %v1129_v1  ;;  %2036 = vmatprep.mubr.bf16.mxu1 %v1129_v1  ;;  %v2777_v1 = vld [vmem:[%s3706_s5 + $0x3c4] ss:$16 sps:$4 sm:$0xff]   ;;  %v2778_v47 = vld [vmem:[%s3706_s5 + $0x3c8] ss:$16 sps:$4 sm:$0xff]  }
 0x1fe   :  { %1955 = vmatmul.mubr.bf16.vlgmr.msra.gmra.mrb[8].mxu0 %v1128_v4  ;;  %2037 = vmatmul.mubr.bf16.vlgmr.msra.gmra.mrb[8].mxu1 %v1128_v4  ;;  %v2373_v4 = vadd.f32 %v3491_v52, %v311_v0  ;;  %v2784_v52 = vld [vmem:[%s3706_s5 + $0x3e8] ss:$16 sps:$4 sm:$0xff]  }
 0x1ff   :  { %1964 = vmatpush1.bf16.msra.mxu0 %v2691_v2  ;;  %2046 = vmatpush1.bf16.msra.mxu1 %v2694_v3  ;;  %v2780_v2 = vld [vmem:[%s3706_s5 + $0x3cc] ss:$16 sps:$4 sm:$0xff]   ;;  %v2775_v3 = vld [vmem:[%s3706_s5 + $0x3c0] ss:$16 sps:$4 sm:$0xff]  }
 0x200   :  { %1995 = vmatprep.mubr.bf16.mxu0 %v1131_v7  ;;  %2077 = vmatprep.mubr.bf16.mxu1 %v1131_v7  ;;  %v2781_v7 = vld [vmem:[%s3706_s5 + $0x3e0] ss:$16 sps:$4 sm:$0xff]  }
 0x201   :  { %1965 = vmatprep.subr.bf16.mxu0 %v2699_v5  ;;  %2047 = vmatprep.subr.bf16.mxu1 %v2702_v6  ;;  %v2783_v5 = vld [vmem:[%s3706_s5 + $0x3e4] ss:$16 sps:$4 sm:$0xff]   ;;  %v2786_v6 = vld [vmem:[%s3706_s5 + $0x3ec] ss:$16 sps:$4 sm:$0xff]   ;;  %s2812_s5 = smov [#allocation2]  }
 0x202   :  { %s2101_s22 = sshll.u32 %s2812_s5, 4  ;;  %s2102_s22 = int_to_ptr.vmem [resolvable:$true] %s2101_s22 }
 0x203   :  { %1966 = vmatpush1.bf16.msra.mxu0 %v2697_v8  ;;  %2048 = vmatpush1.bf16.msra.mxu1 %v2700_v9  ;;  %v1126_v8 = vmax.f32 %v2373_v4, 0.0  ;;  %p2792_p1 = scmp.lt.s32.totalorder %s2102_s22, %s2102_s22 }
 0x204   :  { %1967 = vmatprep.subr.bf16.mxu0 %v2705_v15  ;;  %2049 = vmatprep.subr.bf16.mxu1 %v2708_v16  ;;  %v1260_v15 = vld [vmem:[%s3707_s6] sm:$0xf]  ;;  %s2787_s6 = scalar_lea.vmem %s2102_s22, 512 }
 0x205   :  { %v1130_v9 = vpack.c.bf16 %v1126_v8, %v1126_v8  ;;  %v1265_v16 = vrot.slane %v1260_v15, %v3069_v11  ;;  %p2788_p0 = scmp.ne.s32.totalorder %s2102_s22, %s2787_s6  ;;  %p2793_p2 = scmp.lt.s32.totalorder %s2787_s6, %s2787_s6 }
 0x207   :  { %1968 = vmatpush1.bf16.msra.mxu0 %v2703_v17  ;;  %2050 = vmatpush1.bf16.msra.mxu1 %v2706_v18  ;;  %v1273_v17 = vrot.slane %v1260_v15, %v3241_v27  ;;  %v1269_v18 = vrot.slane %v1260_v15, %v3077_v13  ;;  %p2794_p3 = por %p2793_p2, %p2792_p1 }
 0x208   :  { %1969 = vmatprep.subr.bf16.mxu0 %v2711_v19  ;;  %2051 = vmatprep.subr.bf16.mxu1 %v2714_v20  ;;  %v1277_v19 = vrot.slane %v1260_v15, %v3080_v14 }
 0x209   :  { %p2795_p4 = pnand %p2794_p3, %p2788_p0 }
 0x20b   :  { %1970 = vmatpush1.bf16.msra.mxu0 %v2709_v21  ;;  %2052 = vmatpush1.bf16.msra.mxu1 %v2712_v22 }
 0x20c   :  { %1971 = vmatprep.subr.bf16.mxu0 %v2717_v24  ;;  %2053 = vmatprep.subr.bf16.mxu1 %v2720_v25 }
 0x20f   :  { %1972 = vmatpush1.bf16.msra.mxu0 %v2715_v26  ;;  %2054 = vmatpush1.bf16.msra.mxu1 %v2718_v28 }
 0x210   :  { %1973 = vmatprep.subr.bf16.mxu0 %v2723_v29  ;;  %2055 = vmatprep.subr.bf16.mxu1 %v2726_v30 }
 0x213   :  { %1974 = vmatpush1.bf16.msra.mxu0 %v2721_v31  ;;  %2056 = vmatpush1.bf16.msra.mxu1 %v2724_v10 }
 0x214   :  { %1975 = vmatprep.subr.bf16.mxu0 %v2729_v32  ;;  %2057 = vmatprep.subr.bf16.mxu1 %v2732_v33 }
 0x217   :  { %1976 = vmatpush1.bf16.msra.mxu0 %v2727_v34  ;;  %2058 = vmatpush1.bf16.msra.mxu1 %v2730_v12 }
 0x218   :  { %1977 = vmatprep.subr.bf16.mxu0 %v2735_v35  ;;  %2059 = vmatprep.subr.bf16.mxu1 %v2738_v36 }
 0x21b   :  { %1978 = vmatpush1.bf16.msra.mxu0 %v2733_v37  ;;  %2060 = vmatpush1.bf16.msra.mxu1 %v2736_v38 }
 0x21c   :  { %1979 = vmatprep.subr.bf16.mxu0 %v2741_v23  ;;  %2061 = vmatprep.subr.bf16.mxu1 %v2744_v39 }
 0x21f   :  { %1980 = vmatpush1.bf16.msra.mxu0 %v2739_v40  ;;  %2062 = vmatpush1.bf16.msra.mxu1 %v2742_v41 }
 0x220   :  { %1981 = vmatprep.subr.bf16.mxu0 %v2747_v42  ;;  %2063 = vmatprep.subr.bf16.mxu1 %v2750_v43 }
 0x223   :  { %1982 = vmatpush1.bf16.msra.mxu0 %v2745_v44  ;;  %2064 = vmatpush1.bf16.msra.mxu1 %v2748_v45 }
 0x224   :  { %1983 = vmatprep.subr.bf16.mxu0 %v2753_v46  ;;  %2065 = vmatprep.subr.bf16.mxu1 %v2756_v48 }
 0x227   :  { %1984 = vmatpush1.bf16.msra.mxu0 %v2751_v49  ;;  %2066 = vmatpush1.bf16.msra.mxu1 %v2754_v50 }
 0x228   :  { %1985 = vmatprep.subr.bf16.mxu0 %v2759_v51  ;;  %2067 = vmatprep.subr.bf16.mxu1 %v2762_v53 }
 0x22b   :  { %1986 = vmatpush1.bf16.msra.mxu0 %v2757_v54  ;;  %2068 = vmatpush1.bf16.msra.mxu1 %v2760_v55 }
 0x22c   :  { %1987 = vmatprep.subr.bf16.mxu0 %v2765_v56  ;;  %2069 = vmatprep.subr.bf16.mxu1 %v2768_v57 }
 0x22f   :  { %1988 = vmatpush1.bf16.msra.mxu0 %v2763_v58  ;;  %2070 = vmatpush1.bf16.msra.mxu1 %v2766_v59 }
 0x230   :  { %1989 = vmatprep.subr.bf16.mxu0 %v2771_v60  ;;  %2071 = vmatprep.subr.bf16.mxu1 %v2774_v61 }
 0x233   :  { %1990 = vmatpush1.bf16.msra.mxu0 %v2769_v62  ;;  %2072 = vmatpush1.bf16.msra.mxu1 %v2772_v63 }
 0x234   :  { %1991 = vmatprep.subr.bf16.mxu0 %v2777_v1  ;;  %2073 = vmatprep.subr.bf16.mxu1 %v2780_v2 }
 0x237   :  { %1992 = vmatpush1.bf16.msra.mxu0 %v2775_v3  ;;  %2074 = vmatpush1.bf16.msra.mxu1 %v2778_v47 }
 0x238   :  { %1993 = vmatprep.subr.bf16.mxu0 %v2783_v5  ;;  %2075 = vmatprep.subr.bf16.mxu1 %v2786_v6 }
 0x23b   :  { %1994 = vmatpush1.bf16.msra.mxu0 %v2781_v7  ;;  %2076 = vmatpush1.bf16.msra.mxu1 %v2784_v52 }
 0x23e   :  { %1996 = vmatmul.mubr.bf16.vlgmr.msra.gmra.mrb[8].mxu0 %v1130_v9  ;;  %2078 = vmatmul.mubr.bf16.vlgmr.msra.gmra.mrb[8].mxu1 %v1130_v9 }
 0x311   :  { %v1997_v20 = vpop.f32.mrb[8].mxu0  ;;  %v2079_v21 = vpop.f32.mrb[8].mxu1 }
 0x312   :  { %v2375_v22 = vadd.f32 %v1997_v20, %v1265_v16  ;;  %v2377_v24 = vadd.f32 %v2079_v21, %v1273_v17  ;;  %v1999_v25 = vpop.f32.mrb[9].mxu0  ;;  %v2081_v26 = vpop.f32.mrb[9].mxu1 }
 0x313   :  { %v2376_v28 = vadd.f32 %v1999_v25, %v1269_v18  ;;  %v2378_v29 = vadd.f32 %v2081_v26, %v1277_v19  ;;  %v2001_v30 = vpop.f32.mrb[10].mxu0  ;;  %v2083_v31 = vpop.f32.mrb[10].mxu1 }
 0x314   :  { %v2086_v10 = vmax.f32 %v2375_v22, 0.0  ;;  %v2088_v11 = vmax.f32 %v2377_v24, 0.0  ;;  %v2002_v27 = vpop.f32.mrb[11].mxu0  ;;  %v2084_v32 = vpop.f32.mrb[11].mxu1 }
 0x315   :  { %v2087_v13 = vmax.f32 %v2376_v28, 0.0  ;;  %v2089_v33 = vmax.f32 %v2378_v29, 0.0 }
 0x316   :  { %2090 = vst [vmem:[#allocation2] sm:$0xff] %v2086_v10  ;;  %2092 = vst [vmem:[#allocation2 + $0x10] sm:$0xff] %v2088_v11 }
 0x317   :  { %2091 = vst [vmem:[#allocation2 + $0x8] sm:$0xff] %v2087_v13  ;;  %2094 = vst.msk [vmem:[#allocation2 + $0x18] sm:$0xff] %vm2093_vm1, %v2089_v33 }
 0x318   :  { %2798 = shalt.err (!%p2795_p4)
}
 0x319   :  { %s2799_s25 = scalar_lea.hbm %s3708_s7, 512 }
 0x31a   :  { %p2800_p5 = scmp.ne.s32.totalorder %s3708_s7, %s2799_s25  ;;  %p2803_p6 = scmp.lt.u32.totalorder %s2799_s25, %s3708_s7 }
 0x31c   :  { %p2805_p7 = pnand %p2803_p6, %p2800_p5 }
 0x31e   :  { %2808 = shalt.err (!%p2805_p7)
}
 0x31f   :  { %2104 = dma.vmem_to_hbm [thread:$0]  %s2102_s22, 512, %s3708_s7, [#allocation3]  }
 0x320   :  { %2809 = dma.done.wait [#allocation3], 512  }
 0x321   :  { %2810 = vsyncadd [#allocation3], 4294966784 }
 0x322   :  { %2108 = vsyncpa [#allocation3], 1 }

</bundles_post_ra>
